<compile_context>
chip_gen: v5e
topology: v5e:2x2
jax: 0.10.0
libtpu: 0.0.40
codegen_flags: <defaults>
</compile_context>

<pallas_src>
import jax
import jax.numpy as jnp
from jax.experimental import pallas as pl
from jax.experimental.pallas import tpu as pltpu

LANES = 128  # TPU lane width; every layer is padded out to this many columns.


def _round_up(n, m):
    return (n + m - 1) // m * m


def _make_kernel(in_pad):
    """Kernel closure with static slab offsets baked in."""
    w1_lo = 0
    w2_lo = in_pad                 # W2 section is LANES rows (h1 is 128 wide)
    w3_lo = in_pad + LANES
    b_row = in_pad + 2 * LANES     # b1 / b2 / b3 on consecutive rows

    def kernel(x_ref, p_ref, o_ref):
        x = x_ref[...]                                   # (TB, in_pad)
        w1 = p_ref[w1_lo:w1_lo + in_pad, :]              # (in_pad, 128)
        w2 = p_ref[w2_lo:w2_lo + LANES, :]               # (128, 128)
        w3 = p_ref[w3_lo:w3_lo + LANES, :]               # (128, 128)
        b1 = p_ref[b_row:b_row + 1, :]                   # (1, 128)
        b2 = p_ref[b_row + 1:b_row + 2, :]
        b3 = p_ref[b_row + 2:b_row + 3, :]

        # fc1 + relu  (MXU matmul with f32 accumulation, VPU bias/relu)
        h1 = jnp.maximum(
            jnp.dot(x, w1, preferred_element_type=jnp.float32) + b1, 0.0)
        # fc2 + relu
        h2 = jnp.maximum(
            jnp.dot(h1, w2, preferred_element_type=jnp.float32) + b2, 0.0)
        # fc3 (no activation) -> lane-dense (TB, 128) store
        o_ref[...] = (
            jnp.dot(h2, w3, preferred_element_type=jnp.float32) + b3
        ).astype(o_ref.dtype)

    return kernel


def pack_params(params):
    """Pack (w1,b1,w2,b2,w3,b3) into one zero-padded (rows, 128) f32 slab.

    Layout (rows):
      [0, in_pad)                 : W1 (in_size x hid), zero padded
      [in_pad, in_pad+128)        : W2 (hid x hid),     zero padded
      [in_pad+128, in_pad+256)    : W3 (hid x out),     zero padded
      in_pad+256 / +257 / +258    : b1 / b2 / b3
    """
    w1, b1, w2, b2, w3, b3 = params
    in_size, hid = w1.shape
    out_size = w3.shape[1]
    assert hid <= LANES and out_size <= LANES

    in_pad = _round_up(in_size, 8)
    rows = _round_up(in_pad + 2 * LANES + 3, 8)

    slab = jnp.zeros((rows, LANES), jnp.float32)
    slab = slab.at[0:in_size, 0:hid].set(w1.astype(jnp.float32))
    slab = slab.at[in_pad:in_pad + hid, 0:hid].set(w2.astype(jnp.float32))
    slab = slab.at[in_pad + LANES:in_pad + LANES + hid, 0:out_size].set(
        w3.astype(jnp.float32))
    b_row = in_pad + 2 * LANES
    slab = slab.at[b_row, 0:hid].set(b1.reshape(-1).astype(jnp.float32))
    slab = slab.at[b_row + 1, 0:hid].set(b2.reshape(-1).astype(jnp.float32))
    slab = slab.at[b_row + 2, 0:out_size].set(b3.reshape(-1).astype(jnp.float32))
    return slab


def dqn_forward(x, params, *, block_batch=512):
    """3-layer MLP forward in one Pallas kernel, tiled over the batch.

    block_batch: batch-tile rows (TB).  512 is a good default on all
    generations; sized well inside even v7x's 64 MiB VMEM with the 128-lane
    padded output double-buffered.
    """
    w1, _, _, _, w3, _ = params
    in_size = w1.shape[0]
    out_size = w3.shape[1]

    batch = x.shape[0]
    in_pad = _round_up(in_size, 8)

    # Batch tile: multiple of 8 sublanes, no bigger than the (padded) batch.
    tb = min(block_batch, _round_up(batch, 8))
    tb = _round_up(tb, 8)
    batch_pad = _round_up(batch, tb)
    grid = (batch_pad // tb,)

    # Zero-pad x to (batch_pad, in_pad); padded rows/cols contribute nothing.
    x_pad = jnp.zeros((batch_pad, in_pad), jnp.float32)
    x_pad = x_pad.at[:batch, :in_size].set(x.astype(jnp.float32))

    slab = pack_params(params)
    rows = slab.shape[0]

    kernel = _make_kernel(in_pad)

    cost = pl.CostEstimate(
        flops=2 * batch_pad * (in_pad * LANES + LANES * LANES + LANES * LANES),
        transcendentals=0,
        bytes_accessed=x_pad.size * 4 + slab.size * 4 + batch_pad * LANES * 4,
    )

    out_pad = pl.pallas_call(
        kernel,
        out_shape=jax.ShapeDtypeStruct((batch_pad, LANES), jnp.float32),
        grid=grid,
        in_specs=[
            # x streams over the batch grid.
            pl.BlockSpec((tb, in_pad), lambda i: (i, 0)),
            # Parameter slab: same block every step -> DMA'd once, VMEM-resident.
            pl.BlockSpec((rows, LANES), lambda i: (0, 0)),
        ],
        out_specs=pl.BlockSpec((tb, LANES), lambda i: (i, 0)),
        compiler_params=pltpu.CompilerParams(
            dimension_semantics=("parallel",)),
        cost_estimate=cost,
    )(x_pad, slab)

    return out_pad[:batch, :out_size]


def init_params(key, input_size, hidden, output_size):
    """Deterministic init mimicking PyTorch's default Linear init (uniform
    in +/- 1/sqrt(fan_in)).  Weights stored as (in, out) so x @ W + b matches
    PyTorch's x @ W.T + b with W (out, in)."""
    ks = jax.random.split(key, 6)

    def lin(kw, kb, fan_in, fan_out):
        bound = 1.0 / jnp.sqrt(fan_in)
        w = jax.random.uniform(kw, (fan_in, fan_out), jnp.float32, -bound, bound)
        b = jax.random.uniform(kb, (1, fan_out), jnp.float32, -bound, bound)
        return w, b

    w1, b1 = lin(ks[0], ks[1], input_size, hidden)
    w2, b2 = lin(ks[2], ks[3], hidden, hidden)
    w3, b3 = lin(ks[4], ks[5], hidden, output_size)
    return (w1, b1, w2, b2, w3, b3)


def dqn_reference(x, params):
    w1, b1, w2, b2, w3, b3 = params
    h1 = jnp.maximum(x @ w1 + b1, 0.0)
    h2 = jnp.maximum(h1 @ w2 + b2, 0.0)
    return h2 @ w3 + b3


if __name__ == "__main__":
    # CartPole-v1: observation dim = 4, action dim = 2.
    INPUT_SIZE = 4
    HIDDEN = 64
    OUTPUT_SIZE = 2

    key = jax.random.PRNGKey(0)
    k_x1, k_x2, k_p = jax.random.split(key, 3)

    params = init_params(k_p, INPUT_SIZE, HIDDEN, OUTPUT_SIZE)

    # Small single-tile case (typical act() batch).
    x_small = jax.random.normal(k_x1, (8, INPUT_SIZE), dtype=jnp.float32)
    out_small = jax.block_until_ready(dqn_forward(x_small, params))
    ref_small = dqn_reference(x_small, params)
    assert out_small.shape == (8, OUTPUT_SIZE)
    assert jnp.allclose(out_small, ref_small, atol=1e-4, rtol=1e-4)

    # Multi-tile case exercising the batch grid + padding path (replay batch).
    x_big = jax.random.normal(k_x2, (200, INPUT_SIZE), dtype=jnp.float32)
    out_big = jax.block_until_ready(dqn_forward(x_big, params, block_batch=64))
    ref_big = dqn_reference(x_big, params)
    assert out_big.shape == (200, OUTPUT_SIZE)
    assert jnp.allclose(out_big, ref_big, atol=1e-4, rtol=1e-4)

    print("KERNEL_OK")
</pallas_src>

<mosaic_0001>
module attributes {stable_mosaic.version = 11 : i64} {
  func.func @kernel(%arg0: i32, %arg1: memref<8x8xf32, #tpu.memory_space<vmem>>, %arg2: memref<272x128xf32, #tpu.memory_space<vmem>>, %arg3: memref<8x128xf32, #tpu.memory_space<vmem>>) attributes {dimension_semantics = [#tpu.dimension_semantics<parallel>], iteration_bounds = array<i64: 1>, scalar_prefetch = 0 : i64, scratch_operands = 0 : i64, tpu.core_type = #tpu.core_type<tc>, window_params = [{transform_indices = @transform_0, window_bounds = array<i64: 8, 8>}, {pipeline_mode = #tpu.pipeline_mode<synchronous>, transform_indices = @transform_1, window_bounds = array<i64: 272, 128>}, {transform_indices = @transform_2, window_bounds = array<i64: 8, 128>}]} {
    %c0 = arith.constant 0 : index
    %c0_0 = arith.constant 0 : index
    %0 = vector.load %arg1[%c0, %c0_0] : memref<8x8xf32, #tpu.memory_space<vmem>>, vector<8x8xf32>
    %c0_1 = arith.constant 0 : index
    %c0_2 = arith.constant 0 : index
    %1 = vector.load %arg2[%c0_1, %c0_2] : memref<272x128xf32, #tpu.memory_space<vmem>>, vector<8x128xf32>
    %c8 = arith.constant 8 : index
    %c0_3 = arith.constant 0 : index
    %2 = vector.load %arg2[%c8, %c0_3] : memref<272x128xf32, #tpu.memory_space<vmem>>, vector<128x128xf32>
    %c136 = arith.constant 136 : index
    %c0_4 = arith.constant 0 : index
    %3 = vector.load %arg2[%c136, %c0_4] : memref<272x128xf32, #tpu.memory_space<vmem>>, vector<128x128xf32>
    %c264 = arith.constant 264 : index
    %c0_5 = arith.constant 0 : index
    %4 = vector.load %arg2[%c264, %c0_5] : memref<272x128xf32, #tpu.memory_space<vmem>>, vector<1x128xf32>
    %c265 = arith.constant 265 : index
    %c0_6 = arith.constant 0 : index
    %5 = vector.load %arg2[%c265, %c0_6] : memref<272x128xf32, #tpu.memory_space<vmem>>, vector<1x128xf32>
    %c266 = arith.constant 266 : index
    %c0_7 = arith.constant 0 : index
    %6 = vector.load %arg2[%c266, %c0_7] : memref<272x128xf32, #tpu.memory_space<vmem>>, vector<1x128xf32>
    %cst = arith.constant dense<0.000000e+00> : vector<8x128xf32>
    %7 = tpu.matmul %0, %1, %cst {dimension_numbers = #tpu.dot_dimension_numbers<[1], [0], [0], [1], [0, 0, 1, 1], [], []>} : vector<8x8xf32>, vector<8x128xf32>, vector<8x128xf32> -> vector<8x128xf32>
    %8 = vector.broadcast %4 : vector<1x128xf32> to vector<8x128xf32>
    %9 = arith.addf %7, %8 : vector<8x128xf32>
    %cst_8 = arith.constant 0.000000e+00 : f32
    %10 = vector.broadcast %cst_8 : f32 to vector<8x128xf32>
    %11 = arith.maximumf %9, %10 : vector<8x128xf32>
    %cst_9 = arith.constant dense<0.000000e+00> : vector<8x128xf32>
    %12 = tpu.matmul %11, %2, %cst_9 {dimension_numbers = #tpu.dot_dimension_numbers<[1], [0], [0], [1], [0, 0, 1, 1], [], []>} : vector<8x128xf32>, vector<128x128xf32>, vector<8x128xf32> -> vector<8x128xf32>
    %13 = vector.broadcast %5 : vector<1x128xf32> to vector<8x128xf32>
    %14 = arith.addf %12, %13 : vector<8x128xf32>
    %cst_10 = arith.constant 0.000000e+00 : f32
    %15 = vector.broadcast %cst_10 : f32 to vector<8x128xf32>
    %16 = arith.maximumf %14, %15 : vector<8x128xf32>
    %cst_11 = arith.constant dense<0.000000e+00> : vector<8x128xf32>
    %17 = tpu.matmul %16, %3, %cst_11 {dimension_numbers = #tpu.dot_dimension_numbers<[1], [0], [0], [1], [0, 0, 1, 1], [], []>} : vector<8x128xf32>, vector<128x128xf32>, vector<8x128xf32> -> vector<8x128xf32>
    %18 = vector.broadcast %6 : vector<1x128xf32> to vector<8x128xf32>
    %19 = arith.addf %17, %18 : vector<8x128xf32>
    %c0_12 = arith.constant 0 : index
    %c0_13 = arith.constant 0 : index
    %20 = vector.load %arg3[%c0_12, %c0_13] : memref<8x128xf32, #tpu.memory_space<vmem>>, vector<8x128xf32>
    tpu.vector_store %arg3[%c0_12, %c0_13], %19 {strides = array<i32>} : memref<8x128xf32, #tpu.memory_space<vmem>>, vector<8x128xf32>,
    return
  }
  func.func @transform_0(%arg0: i32) -> (i32, i32) {
    %c0_i32 = arith.constant 0 : i32
    %c0_i32_0 = arith.constant 0 : i32
    return %arg0, %c0_i32 : i32, i32
  }
  func.func @transform_1(%arg0: i32) -> (i32, i32) {
    %c0_i32 = arith.constant 0 : i32
    %c0_i32_0 = arith.constant 0 : i32
    %c0_i32_1 = arith.constant 0 : i32
    return %c0_i32, %c0_i32_0 : i32, i32
  }
  func.func @transform_2(%arg0: i32) -> (i32, i32) {
    %c0_i32 = arith.constant 0 : i32
    %c0_i32_0 = arith.constant 0 : i32
    return %arg0, %c0_i32 : i32, i32
  }
}

</mosaic_0001>

<bundles_post_ra>
// kernel: tpu_custom_call.1
= control target key start
LH: loop header
LB: loop body
LE: loop exit
PB: predicated region body
PF: predicated region fallthrough
CT: control target
= control target key end

     0   :  { %7 = vsyncpa [#allocation3], 0  ;;  %s283_s0 = inlined_call_operand.hbm [shape: f32[8,8], index: 0, kind: input, shape index: {}]   ;;  %s284_s1 = inlined_call_operand.hbm [shape: f32[272,128], index: 1, kind: input, shape index: {}]   ;;  %s285_s2 = inlined_call_operand.hbm [shape: f32[8,128], index: 2, kind: output, shape index: {}]  }
   0x1   :  { %8 = vsyncpa [#allocation6], 0 }
   0x2   :  { %9 = vsyncpa [#allocation4], 0  ;;  %s15_s11 = sshll.u32 %s283_s0, 4  ;;  %s254_s12 = smov [#allocation2]   ;;  %s16_s11 = int_to_ptr.hbm [resolvable:$true] %s15_s11 }
   0x3   :  { %s17_s13 = sshll.u32 %s254_s12, 4  ;;  %s25_s16 = sshll.u32 %s284_s1, 4  ;;  %s18_s13 = int_to_ptr.vmem [resolvable:$true] %s17_s13  ;;  %s26_s16 = int_to_ptr.hbm [resolvable:$true] %s25_s16 }
   0x4   :  { %20 = dma.hbm_to_vmem [thread:$0]  %s16_s11, 128, %s18_s13, [#allocation3]  }
   0x5   :  { %s255_s17 = smov [#allocation5]   ;;  %s256_s19 = smov 128  }
   0x6   :  { %s27_s18 = sshll.u32 %s255_s17, 4  ;;  %s257_s20 = smov 8   ;;  %s28_s18 = int_to_ptr.vmem [resolvable:$true] %s27_s18 }
   0x7   :  { %33 = dma.hbm_to_vmem [thread:$0]  %s26_s16, 4352, %s28_s18, [#allocation6], %s256_s19, %s256_s19, %s257_s20  }
   0x8   :  { %248 = dma.done.wait [#allocation3], 128  }
   0x9   :  { %249 = vsyncadd [#allocation3], 4294967168 }
   0xa   :  { %250 = dma.done.wait [#allocation6], 4352  }
   0xb   :  { %251 = vsyncadd [#allocation6], 4294962944  ;;  %vm80_vm0 = vcmask 64512   ;;  %v43_v0 = vld [vmem:[#allocation5] sm:$0xff]  ;;  %v42_v1 = vld [vmem:[#allocation2] sm:$0xff]  ;;  %s258_s0 = smov [#allocation7]  }
   0xc   :  { %v59_v2 = vld [vmem:[#allocation5 + $0x80] sm:$0xff]  ;;  %99 = vmatpush.msra.mxu0 %v43_v0  ;;  %v58_v3 = vld [vmem:[#allocation5 + $0x78] sm:$0xff]  ;;  %v57_v4 = vld [vmem:[#allocation5 + $0x70] sm:$0xff]  ;;  %s154_s1 = sshll.u32 %s258_s0, 4  ;;  %s156_s23 = sshll.u32 %s285_s2, 4  ;;  %s155_s1 = int_to_ptr.vmem [resolvable:$true] %s154_s1  ;;  %s157_s23 = int_to_ptr.hbm [resolvable:$true] %s156_s23 }
   0xd   :  { %106 = vmatpush.msra.mxu1 %v59_v2  ;;  %167 = vmatmul.msk.f32.vlgmr.msra.gmra.mxu0 %vm80_vm0, %v42_v1  ;;  %v56_v5 = vld [vmem:[#allocation5 + $0x68] sm:$0xff]  ;;  %v55_v6 = vld [vmem:[#allocation5 + $0x60] sm:$0xff]  ;;  %v54_v7 = vld [vmem:[#allocation5 + $0x58] sm:$0xff] }
   0xe   :  { %v53_v8 = vld [vmem:[#allocation5 + $0x50] sm:$0xff]  ;;  %v52_v9 = vld [vmem:[#allocation5 + $0x48] sm:$0xff]  ;;  %v51_v10 = vld [vmem:[#allocation5 + $0x40] sm:$0xff] }
   0xf   :  { %107 = vmatpush.msra.mxu1 %v58_v3  ;;  %v50_v11 = vld [vmem:[#allocation5 + $0x38] sm:$0xff]  ;;  %v49_v12 = vld [vmem:[#allocation5 + $0x30] sm:$0xff]  ;;  %v48_v13 = vld [vmem:[#allocation5 + $0x28] sm:$0xff] }
  0x10   :  { %v47_v14 = vld [vmem:[#allocation5 + $0x20] sm:$0xff]  ;;  %v46_v15 = vld [vmem:[#allocation5 + $0x18] sm:$0xff]  ;;  %v45_v16 = vld [vmem:[#allocation5 + $0x10] sm:$0xff] }
  0x11   :  { %108 = vmatpush.msra.mxu1 %v57_v4  ;;  %v44_v17 = vld [vmem:[#allocation5 + $0x8] sm:$0xff]  ;;  %v75_v18 = vld [vmem:[#allocation5 + $0x100] sm:$0xff]  ;;  %v74_v19 = vld [vmem:[#allocation5 + $0xf8] sm:$0xff] }
  0x12   :  { %128 = vmatpush.msra.mxu2 %v75_v18  ;;  %v73_v20 = vld [vmem:[#allocation5 + $0xf0] sm:$0xff]  ;;  %v72_v21 = vld [vmem:[#allocation5 + $0xe8] sm:$0xff]  ;;  %v71_v22 = vld [vmem:[#allocation5 + $0xe0] sm:$0xff] }
  0x13   :  { %109 = vmatpush.msra.mxu1 %v56_v5  ;;  %v70_v23 = vld [vmem:[#allocation5 + $0xd8] sm:$0xff]  ;;  %v69_v24 = vld [vmem:[#allocation5 + $0xd0] sm:$0xff]  ;;  %v68_v25 = vld [vmem:[#allocation5 + $0xc8] sm:$0xff] }
  0x14   :  { %129 = vmatpush.msra.mxu2 %v74_v19  ;;  %v67_v26 = vld [vmem:[#allocation5 + $0xc0] sm:$0xff]  ;;  %v66_v27 = vld [vmem:[#allocation5 + $0xb8] sm:$0xff]  ;;  %v65_v28 = vld [vmem:[#allocation5 + $0xb0] sm:$0xff] }
  0x15   :  { %110 = vmatpush.msra.mxu1 %v55_v6  ;;  %v64_v29 = vld [vmem:[#allocation5 + $0xa8] sm:$0xff]  ;;  %v63_v30 = vld [vmem:[#allocation5 + $0xa0] sm:$0xff]  ;;  %v62_v35 = vld [vmem:[#allocation5 + $0x98] sm:$0xff] }
  0x16   :  { %130 = vmatpush.msra.mxu2 %v73_v20  ;;  %v173_v31 = vld [vmem:[#allocation5 + $0x108] ss:$0 sm:$0xff]  ;;  %v61_v36 = vld [vmem:[#allocation5 + $0x90] sm:$0xff]  ;;  %v174_v38 = vld [vmem:[#allocation5 + $0x109] ss:$0 sm:$0xff] }
  0x17   :  { %111 = vmatpush.msra.mxu1 %v54_v7  ;;  %v60_v37 = vld [vmem:[#allocation5 + $0x88] sm:$0xff] }
  0x18   :  { %131 = vmatpush.msra.mxu2 %v72_v21  ;;  %v175_v42 = vld [vmem:[#allocation5 + $0x10a] ss:$0 sm:$0xff] }
  0x19   :  { %112 = vmatpush.msra.mxu1 %v53_v8 }
  0x1a   :  { %132 = vmatpush.msra.mxu2 %v71_v22 }
  0x1b   :  { %113 = vmatpush.msra.mxu1 %v52_v9 }
  0x1c   :  { %133 = vmatpush.msra.mxu2 %v70_v23 }
  0x1d   :  { %114 = vmatpush.msra.mxu1 %v51_v10 }
  0x1e   :  { %134 = vmatpush.msra.mxu2 %v69_v24 }
  0x1f   :  { %115 = vmatpush.msra.mxu1 %v50_v11 }
  0x20   :  { %135 = vmatpush.msra.mxu2 %v68_v25 }
  0x21   :  { %116 = vmatpush.msra.mxu1 %v49_v12 }
  0x22   :  { %136 = vmatpush.msra.mxu2 %v67_v26 }
  0x23   :  { %117 = vmatpush.msra.mxu1 %v48_v13 }
  0x24   :  { %137 = vmatpush.msra.mxu2 %v66_v27 }
  0x25   :  { %118 = vmatpush.msra.mxu1 %v47_v14 }
  0x26   :  { %138 = vmatpush.msra.mxu2 %v65_v28 }
  0x27   :  { %119 = vmatpush.msra.mxu1 %v46_v15 }
  0x28   :  { %139 = vmatpush.msra.mxu2 %v64_v29 }
  0x29   :  { %120 = vmatpush.msra.mxu1 %v45_v16 }
  0x2a   :  { %140 = vmatpush.msra.mxu2 %v63_v30 }
  0x2b   :  { %121 = vmatpush.msra.mxu1 %v44_v17 }
  0x2c   :  { %141 = vmatpush.msra.mxu2 %v62_v35 }
  0x2e   :  { %142 = vmatpush.msra.mxu2 %v61_v36 }
  0x30   :  { %143 = vmatpush.msra.mxu2 %v60_v37 }
  0x8a   :  { %v101_v32 = vpop.f32.mrf.mxu0 }
  0x8b   :  { %v102_v33 = vadd.f32 %v173_v31, %v101_v32 }
  0x8d   :  { %v104_v34 = vmax.f32 %v102_v33, 0.0 }
  0x8f   :  { %122 = vmatmul.f32.vlgmr.msra.gmra.mxu1 %v104_v34 }
 0x10c   :  { %v123_v39 = vpop.f32.mrf.mxu1 }
 0x10d   :  { %v124_v40 = vadd.f32 %v174_v38, %v123_v39 }
 0x10f   :  { %v126_v41 = vmax.f32 %v124_v40, 0.0 }
 0x111   :  { %144 = vmatmul.f32.vlgmr.msra.gmra.mxu2 %v126_v41 }
 0x194   :  { %v145_v43 = vpop.f32.mrf.mxu2 }
 0x195   :  { %v146_v44 = vadd.f32 %v175_v42, %v145_v43 }
 0x197   :  { %148 = vst [vmem:[#allocation7] sm:$0xff] %v146_v44 }
 0x198   :  { %159 = dma.vmem_to_hbm [thread:$0]  %s155_s1, 128, %s157_s23, [#allocation4]  }
 0x199   :  { %252 = dma.done.wait [#allocation4], 128  }
 0x19a   :  { %253 = vsyncadd [#allocation4], 4294967168 }
 0x19b   :  { %164 = vsyncpa [#allocation3], 1 }
 0x19c   :  { %165 = vsyncpa [#allocation6], 1 }
 0x19d   :  { %166 = vsyncpa [#allocation4], 1 }

</bundles_post_ra>
